<compile_context>
chip_gen: v7x
topology: tpu7x:2x2x1
jax: 0.10.0
libtpu: 0.0.40
codegen_flags: <defaults>
</compile_context>

<pallas_src>
import math
import jax
import jax.numpy as jnp
from jax.experimental import pallas as pl
from jax.experimental.pallas import tpu as pltpu

# ---- module-consistent small sizes (content_dim % num_heads == 0) ----
B, S = 2, 8            # batch, seq_len
E = 64                 # content_dim
H = 8                  # num_heads
HD = E // H            # head_dim
HID = 32               # hidden_dim
HID2 = HID // 2
PAD = 128              # lane-dense width for the fused PV/denominator RHS and the output
BS = B * S             # fused batch*seq rows             (16)
HS = H * S             # expanded key columns per batch   (64)
NC = B * H * S         # total expanded (b, h, key) cols  (128)


def _rank_predictor_kernel(x_ref, xT_ref, wqv_ref, bqv_ref, wk_ref, bk_ref,
                           expr_ref, expc_ref, hmT_ref, hm2_ref, bbias_ref, pool_ref,
                           w1_ref, b1_ref, w2_ref, b2_ref, w3_ref, b3_ref, out_ref):
    f32 = jnp.float32
    x = x_ref[...]                                                    # (BS, E)

    # ---- depth-1 matmuls (pipeline back-to-back through the MXU) ---------------------
    # Fused [Q*scale | 0 | V | ones] projection; 128-aligned lane slots.
    qv = jnp.dot(x, wqv_ref[...], preferred_element_type=f32) + bqv_ref[...]   # (BS, 256)
    q = qv[:, :E]                                                     # (BS, E)
    vpad = qv[:, PAD:]                                                # (BS, 128) = [v | 1]
    # kT in (E, BS) orientation directly (PyTorch-layout Wk @ x^T) -> no transpose later.
    kT = jnp.dot(wk_ref[...], xT_ref[...], preferred_element_type=f32) + bk_ref[...]  # (E, BS)

    # ---- depth-2: block-diagonal head expansion (masks precomputed host-side, bf16) ---
    kbdT = (jnp.dot(kT, expr_ref[...].astype(f32), preferred_element_type=f32)
            * hmT_ref[...].astype(f32))                               # (E, NC)
    rhs = (jnp.dot(expc_ref[...].astype(f32), vpad, preferred_element_type=f32)
           * hm2_ref[...].astype(f32))                                # (NC, 128) = [Vbd | hmask]

    # ---- depth-3: QK^T for every (batch, head) in one native-layout matmul ------------
    scores = jnp.dot(q, kbdT, preferred_element_type=f32) + bbias_ref[...]     # (BS, NC)
    m = jnp.max(scores, axis=-1, keepdims=True)                       # row-global max (see note)
    p = jnp.exp(scores - m)                                           # cross-batch cols -> 0

    # ---- depth-4: fused PV + per-(row, head) softmax denominator ----------------------
    z = jnp.dot(p, rhs, preferred_element_type=f32)                   # (BS, 128)
    attn = z[:, :E] * pl.reciprocal(jnp.maximum(z[:, E:], 1e-20), approx=True)  # (BS, E)

    # ---- depth-5..8: mean pool (matmul) + MLP; Wo folded into fc1 across the pool -----
    t = jnp.dot(pool_ref[...], attn, preferred_element_type=f32)      # (B, E)
    h1 = jnp.maximum(jnp.dot(t, w1_ref[...], preferred_element_type=f32) + b1_ref[...], 0.0)
    h2 = jnp.maximum(jnp.dot(h1, w2_ref[...], preferred_element_type=f32) + b2_ref[...], 0.0)
    out_ref[...] = jnp.dot(h2, w3_ref[...], preferred_element_type=f32) + b3_ref[...]


def improved_rank_predictor(x, kp):
    """Whole forward pass in a single gridless pallas_call; returns (B, 1)."""
    # TODO(synk): key_padding_mask path (attention_mask is not None) not implemented;
    # this implements the default attention_mask=None branch.
    vmem = pl.BlockSpec(memory_space=pltpu.MemorySpace.VMEM)
    x2d = x.reshape(BS, E)
    xT = x2d.T                                   # tiny (E, BS) transpose, off the kernel chain
    args = (x2d, xT, kp["wqv"], kp["bqv"], kp["wk"], kp["bk"],
            kp["expr"], kp["expc"], kp["hmT"], kp["hm2"], kp["bbias"], kp["pool"],
            kp["w1f"], kp["b1f"], kp["w2"], kp["b2"], kp["w3p"], kp["b3p"])
    out_padded = pl.pallas_call(
        _rank_predictor_kernel,
        out_shape=jax.ShapeDtypeStruct((B, PAD), jnp.float32),
        in_specs=[vmem] * len(args),
        out_specs=vmem,
    )(*args)
    return out_padded[:, :1]                     # strip lane padding outside the kernel


def _init_params(key):
    """Deterministic synthetic parameters in PyTorch layouts (shapes from __init__)."""
    ks = jax.random.split(key, 10)
    n = lambda k, shape, s=0.05: (s * jax.random.normal(k, shape)).astype(jnp.float32)
    return {
        "in_w":  n(ks[0], (3 * E, E)),     # nn.MultiheadAttention.in_proj_weight
        "in_b":  n(ks[1], (3 * E,)),
        "out_w": n(ks[2], (E, E)),         # out_proj
        "out_b": n(ks[3], (E,)),
        "fc1_w": n(ks[4], (HID, E)),   "fc1_b": n(ks[5], (HID,)),
        "fc2_w": n(ks[6], (HID2, HID)), "fc2_b": n(ks[7], (HID2,)),
        "fc3_w": n(ks[8], (1, HID2)),  "fc3_b": n(ks[9], (1,)),
    }


def _prepare_params(p):
    """Kernel-ready operands: fused/folded weights + precomputed bf16 mask constants."""
    f32, bf16 = jnp.float32, jnp.bfloat16
    scale = 1.0 / math.sqrt(HD)
    wq, wk, wv = jnp.split(p["in_w"], 3, axis=0)
    bq, bk, bv = jnp.split(p["in_b"], 3, axis=0)

    # Fused [Q*scale | 0 | V | 0] projection; bias supplies the "ones" block (lanes 192:256).
    wqv = jnp.zeros((E, 2 * PAD), f32)
    wqv = wqv.at[:, :E].set(wq.T * scale)
    wqv = wqv.at[:, PAD:PAD + E].set(wv.T)
    bqv = jnp.zeros((1, 2 * PAD), f32)
    bqv = bqv.at[0, :E].set(bq * scale)
    bqv = bqv.at[0, PAD:PAD + E].set(bv)
    bqv = bqv.at[0, PAD + E:].set(1.0)           # -> per-(row, head) denominator lanes

    # Precomputed expansion / mask constants (exact in bf16 for 0/1 values).
    c = jnp.arange(NC); r = jnp.arange(BS); e = jnp.arange(E)
    row_c = (c // HS) * S + (c % S)              # source (batch*S + seq) row of expanded col c
    head_c = (c % HS) // S                       # head of expanded col c
    expr = (row_c[None, :] == r[:, None]).astype(bf16)            # (BS, NC) expansion (cols)
    expc = (row_c[:, None] == r[None, :]).astype(bf16)            # (NC, BS) expansion (rows)
    hmT = ((e[:, None] // HD) == head_c[None, :]).astype(bf16)    # (E, NC) head mask (T)
    hm = (head_c[:, None] == (e[None, :] // HD)).astype(f32)      # (NC, E) head mask
    hm2 = jnp.concatenate([hm, hm], axis=1).astype(bf16)          # (NC, 128) = [mask | mask]
    bbias = jnp.where((r[:, None] // S) == (c[None, :] // HS), 0.0, -1e30).astype(f32)
    pool = ((r[None, :] // S) == jnp.arange(B)[:, None]).astype(f32) / S   # (B, BS) mean-pool

    # Fold the attention out-projection into fc1 across the linear mean pool.
    w1 = p["fc1_w"].T                                              # (E, HID)
    w1f = (p["out_w"].T @ w1).astype(f32)                          # (E, HID)
    b1f = (p["out_b"][None, :] @ w1 + p["fc1_b"][None, :]).astype(f32)      # (1, HID)
    w2 = p["fc2_w"].T.astype(f32)
    b2 = p["fc2_b"].reshape(1, HID2).astype(f32)
    # Only the final weight is lane-padded (keeps the output store lane-dense).
    w3p = jnp.zeros((HID2, PAD), f32).at[:, :1].set(p["fc3_w"].T)
    b3p = jnp.zeros((1, PAD), f32).at[0, 0].set(p["fc3_b"][0])

    return dict(
        wqv=wqv, bqv=bqv,
        wk=wk.astype(f32), bk=bk.reshape(E, 1).astype(f32),
        expr=expr, expc=expc, hmT=hmT, hm2=hm2, bbias=bbias, pool=pool,
        w1f=w1f, b1f=b1f, w2=w2, b2=b2, w3p=w3p, b3p=b3p,
    )


def _reference(x, p):
    """Pure-JAX reference of the same forward pass (PyTorch-layout params)."""
    hp = jax.lax.Precision.HIGHEST
    wq, wk, wv = jnp.split(p["in_w"], 3, axis=0)
    bq, bk, bv = jnp.split(p["in_b"], 3, axis=0)
    q = jnp.einsum("bse,fe->bsf", x, wq, precision=hp) + bq
    k = jnp.einsum("bse,fe->bsf", x, wk, precision=hp) + bk
    v = jnp.einsum("bse,fe->bsf", x, wv, precision=hp) + bv
    sh = lambda t: t.reshape(B, S, H, HD).transpose(0, 2, 1, 3)
    qh, kh, vh = sh(q), sh(k), sh(v)
    s = jnp.einsum("bhqd,bhkd->bhqk", qh, kh, precision=hp) / math.sqrt(HD)
    a = jax.nn.softmax(s, axis=-1)
    o = jnp.einsum("bhqk,bhkd->bhqd", a, vh, precision=hp)
    o = o.transpose(0, 2, 1, 3).reshape(B, S, E)
    y = jnp.einsum("bse,fe->bsf", o, p["out_w"], precision=hp) + p["out_b"]
    pooled = y.mean(axis=1)
    h1 = jax.nn.relu(pooled @ p["fc1_w"].T + p["fc1_b"])
    h2 = jax.nn.relu(h1 @ p["fc2_w"].T + p["fc2_b"])
    return h2 @ p["fc3_w"].T + p["fc3_b"]


if __name__ == "__main__":
    key = jax.random.PRNGKey(0)
    kx, kprm = jax.random.split(key)
    x = jax.random.normal(kx, (B, S, E), dtype=jnp.float32)
    params = _init_params(kprm)
    kparams = _prepare_params(params)

    out = improved_rank_predictor(x, kparams)
    out = jax.block_until_ready(out)

    ref = _reference(x, params)
    assert out.shape == (B, 1)
    assert jnp.allclose(out, ref, rtol=1e-2, atol=1e-2)
    print("KERNEL_OK")
</pallas_src>

<mosaic_0001>
module attributes {stable_mosaic.version = 11 : i64} {
  func.func @_rank_predictor_kernel(%arg0: memref<16x64xf32, #tpu.memory_space<vmem>>, %arg1: memref<64x16xf32, #tpu.memory_space<vmem>>, %arg2: memref<64x256xf32, #tpu.memory_space<vmem>>, %arg3: memref<1x256xf32, #tpu.memory_space<vmem>>, %arg4: memref<64x64xf32, #tpu.memory_space<vmem>>, %arg5: memref<64x1xf32, #tpu.memory_space<vmem>>, %arg6: memref<16x128xbf16, #tpu.memory_space<vmem>>, %arg7: memref<128x16xbf16, #tpu.memory_space<vmem>>, %arg8: memref<64x128xbf16, #tpu.memory_space<vmem>>, %arg9: memref<128x128xbf16, #tpu.memory_space<vmem>>, %arg10: memref<16x128xf32, #tpu.memory_space<vmem>>, %arg11: memref<2x16xf32, #tpu.memory_space<vmem>>, %arg12: memref<64x32xf32, #tpu.memory_space<vmem>>, %arg13: memref<1x32xf32, #tpu.memory_space<vmem>>, %arg14: memref<32x16xf32, #tpu.memory_space<vmem>>, %arg15: memref<1x16xf32, #tpu.memory_space<vmem>>, %arg16: memref<16x128xf32, #tpu.memory_space<vmem>>, %arg17: memref<1x128xf32, #tpu.memory_space<vmem>>, %arg18: memref<2x128xf32, #tpu.memory_space<vmem>>) attributes {dimension_semantics = [], scalar_prefetch = 0 : i64, scratch_operands = 0 : i64, tpu.core_type = #tpu.core_type<tc>} {
    %c0 = arith.constant 0 : index
    %c0_0 = arith.constant 0 : index
    %0 = vector.load %arg0[%c0, %c0_0] : memref<16x64xf32, #tpu.memory_space<vmem>>, vector<16x64xf32>
    %c0_1 = arith.constant 0 : index
    %c0_2 = arith.constant 0 : index
    %1 = vector.load %arg2[%c0_1, %c0_2] : memref<64x256xf32, #tpu.memory_space<vmem>>, vector<64x256xf32>
    %cst = arith.constant dense<0.000000e+00> : vector<16x256xf32>
    %2 = tpu.matmul %0, %1, %cst {dimension_numbers = #tpu.dot_dimension_numbers<[1], [0], [0], [1], [0, 0, 1, 1], [], []>} : vector<16x64xf32>, vector<64x256xf32>, vector<16x256xf32> -> vector<16x256xf32>
    %c0_3 = arith.constant 0 : index
    %c0_4 = arith.constant 0 : index
    %3 = vector.load %arg3[%c0_3, %c0_4] : memref<1x256xf32, #tpu.memory_space<vmem>>, vector<1x256xf32>
    %4 = vector.broadcast %3 : vector<1x256xf32> to vector<16x256xf32>
    %5 = arith.addf %2, %4 : vector<16x256xf32>
    %6 = vector.extract_strided_slice %5 {offsets = [0, 0], sizes = [16, 64], strides = [1, 1]} : vector<16x256xf32> to vector<16x64xf32>
    %7 = vector.extract_strided_slice %5 {offsets = [0, 128], sizes = [16, 128], strides = [1, 1]} : vector<16x256xf32> to vector<16x128xf32>
    %c0_5 = arith.constant 0 : index
    %c0_6 = arith.constant 0 : index
    %8 = vector.load %arg4[%c0_5, %c0_6] : memref<64x64xf32, #tpu.memory_space<vmem>>, vector<64x64xf32>
    %c0_7 = arith.constant 0 : index
    %c0_8 = arith.constant 0 : index
    %9 = vector.load %arg1[%c0_7, %c0_8] : memref<64x16xf32, #tpu.memory_space<vmem>>, vector<64x16xf32>
    %cst_9 = arith.constant dense<0.000000e+00> : vector<64x16xf32>
    %10 = tpu.matmul %8, %9, %cst_9 {dimension_numbers = #tpu.dot_dimension_numbers<[1], [0], [0], [1], [0, 0, 1, 1], [], []>} : vector<64x64xf32>, vector<64x16xf32>, vector<64x16xf32> -> vector<64x16xf32>
    %c0_10 = arith.constant 0 : index
    %c0_11 = arith.constant 0 : index
    %11 = vector.load %arg5[%c0_10, %c0_11] : memref<64x1xf32, #tpu.memory_space<vmem>>, vector<64x1xf32>
    %12 = vector.broadcast %11 : vector<64x1xf32> to vector<64x16xf32>
    %13 = arith.addf %10, %12 : vector<64x16xf32>
    %c0_12 = arith.constant 0 : index
    %c0_13 = arith.constant 0 : index
    %14 = vector.load %arg6[%c0_12, %c0_13] : memref<16x128xbf16, #tpu.memory_space<vmem>>, vector<16x128xbf16>
    %15 = arith.extf %14 : vector<16x128xbf16> to vector<16x128xf32>
    %cst_14 = arith.constant dense<0.000000e+00> : vector<64x128xf32>
    %16 = tpu.matmul %13, %15, %cst_14 {dimension_numbers = #tpu.dot_dimension_numbers<[1], [0], [0], [1], [0, 0, 1, 1], [], []>} : vector<64x16xf32>, vector<16x128xf32>, vector<64x128xf32> -> vector<64x128xf32>
    %c0_15 = arith.constant 0 : index
    %c0_16 = arith.constant 0 : index
    %17 = vector.load %arg8[%c0_15, %c0_16] : memref<64x128xbf16, #tpu.memory_space<vmem>>, vector<64x128xbf16>
    %18 = arith.extf %17 : vector<64x128xbf16> to vector<64x128xf32>
    %19 = arith.mulf %16, %18 : vector<64x128xf32>
    %c0_17 = arith.constant 0 : index
    %c0_18 = arith.constant 0 : index
    %20 = vector.load %arg7[%c0_17, %c0_18] : memref<128x16xbf16, #tpu.memory_space<vmem>>, vector<128x16xbf16>
    %21 = arith.extf %20 : vector<128x16xbf16> to vector<128x16xf32>
    %cst_19 = arith.constant dense<0.000000e+00> : vector<128x128xf32>
    %22 = tpu.matmul %21, %7, %cst_19 {dimension_numbers = #tpu.dot_dimension_numbers<[1], [0], [0], [1], [0, 0, 1, 1], [], []>} : vector<128x16xf32>, vector<16x128xf32>, vector<128x128xf32> -> vector<128x128xf32>
    %c0_20 = arith.constant 0 : index
    %c0_21 = arith.constant 0 : index
    %23 = vector.load %arg9[%c0_20, %c0_21] : memref<128x128xbf16, #tpu.memory_space<vmem>>, vector<128x128xbf16>
    %24 = arith.extf %23 : vector<128x128xbf16> to vector<128x128xf32>
    %25 = arith.mulf %22, %24 : vector<128x128xf32>
    %cst_22 = arith.constant dense<0.000000e+00> : vector<16x128xf32>
    %26 = tpu.matmul %6, %19, %cst_22 {dimension_numbers = #tpu.dot_dimension_numbers<[1], [0], [0], [1], [0, 0, 1, 1], [], []>} : vector<16x64xf32>, vector<64x128xf32>, vector<16x128xf32> -> vector<16x128xf32>
    %c0_23 = arith.constant 0 : index
    %c0_24 = arith.constant 0 : index
    %27 = vector.load %arg10[%c0_23, %c0_24] : memref<16x128xf32, #tpu.memory_space<vmem>>, vector<16x128xf32>
    %28 = arith.addf %26, %27 : vector<16x128xf32>
    %cst_25 = arith.constant dense<0xFF800000> : vector<16xf32>
    %29 = vector.multi_reduction <maximumf>, %28, %cst_25 [1] : vector<16x128xf32> to vector<16xf32>
    %30 = vector.shape_cast %29 : vector<16xf32> to vector<16x1xf32>
    %31 = vector.broadcast %30 : vector<16x1xf32> to vector<16x128xf32>
    %32 = arith.subf %28, %31 : vector<16x128xf32>
    %33 = math.exp %32 : vector<16x128xf32>
    %cst_26 = arith.constant dense<0.000000e+00> : vector<16x128xf32>
    %34 = tpu.matmul %33, %25, %cst_26 {dimension_numbers = #tpu.dot_dimension_numbers<[1], [0], [0], [1], [0, 0, 1, 1], [], []>} : vector<16x128xf32>, vector<128x128xf32>, vector<16x128xf32> -> vector<16x128xf32>
    %35 = vector.extract_strided_slice %34 {offsets = [0, 0], sizes = [16, 64], strides = [1, 1]} : vector<16x128xf32> to vector<16x64xf32>
    %36 = vector.extract_strided_slice %34 {offsets = [0, 64], sizes = [16, 64], strides = [1, 1]} : vector<16x128xf32> to vector<16x64xf32>
    %cst_27 = arith.constant 9.99999968E-21 : f32
    %37 = vector.broadcast %cst_27 : f32 to vector<16x64xf32>
    %38 = arith.maximumf %36, %37 : vector<16x64xf32>
    %39 = tpu.reciprocal %38 {approx = true} : vector<16x64xf32> -> vector<16x64xf32>
    %40 = arith.mulf %35, %39 : vector<16x64xf32>
    %c0_28 = arith.constant 0 : index
    %c0_29 = arith.constant 0 : index
    %41 = vector.load %arg11[%c0_28, %c0_29] : memref<2x16xf32, #tpu.memory_space<vmem>>, vector<2x16xf32>
    %cst_30 = arith.constant dense<0.000000e+00> : vector<2x64xf32>
    %42 = tpu.matmul %41, %40, %cst_30 {dimension_numbers = #tpu.dot_dimension_numbers<[1], [0], [0], [1], [0, 0, 1, 1], [], []>} : vector<2x16xf32>, vector<16x64xf32>, vector<2x64xf32> -> vector<2x64xf32>
    %c0_31 = arith.constant 0 : index
    %c0_32 = arith.constant 0 : index
    %43 = vector.load %arg12[%c0_31, %c0_32] : memref<64x32xf32, #tpu.memory_space<vmem>>, vector<64x32xf32>
    %cst_33 = arith.constant dense<0.000000e+00> : vector<2x32xf32>
    %44 = tpu.matmul %42, %43, %cst_33 {dimension_numbers = #tpu.dot_dimension_numbers<[1], [0], [0], [1], [0, 0, 1, 1], [], []>} : vector<2x64xf32>, vector<64x32xf32>, vector<2x32xf32> -> vector<2x32xf32>
    %c0_34 = arith.constant 0 : index
    %c0_35 = arith.constant 0 : index
    %45 = vector.load %arg13[%c0_34, %c0_35] : memref<1x32xf32, #tpu.memory_space<vmem>>, vector<1x32xf32>
    %46 = vector.broadcast %45 : vector<1x32xf32> to vector<2x32xf32>
    %47 = arith.addf %44, %46 : vector<2x32xf32>
    %cst_36 = arith.constant 0.000000e+00 : f32
    %48 = vector.broadcast %cst_36 : f32 to vector<2x32xf32>
    %49 = arith.maximumf %47, %48 : vector<2x32xf32>
    %c0_37 = arith.constant 0 : index
    %c0_38 = arith.constant 0 : index
    %50 = vector.load %arg14[%c0_37, %c0_38] : memref<32x16xf32, #tpu.memory_space<vmem>>, vector<32x16xf32>
    %cst_39 = arith.constant dense<0.000000e+00> : vector<2x16xf32>
    %51 = tpu.matmul %49, %50, %cst_39 {dimension_numbers = #tpu.dot_dimension_numbers<[1], [0], [0], [1], [0, 0, 1, 1], [], []>} : vector<2x32xf32>, vector<32x16xf32>, vector<2x16xf32> -> vector<2x16xf32>
    %c0_40 = arith.constant 0 : index
    %c0_41 = arith.constant 0 : index
    %52 = vector.load %arg15[%c0_40, %c0_41] : memref<1x16xf32, #tpu.memory_space<vmem>>, vector<1x16xf32>
    %53 = vector.broadcast %52 : vector<1x16xf32> to vector<2x16xf32>
    %54 = arith.addf %51, %53 : vector<2x16xf32>
    %cst_42 = arith.constant 0.000000e+00 : f32
    %55 = vector.broadcast %cst_42 : f32 to vector<2x16xf32>
    %56 = arith.maximumf %54, %55 : vector<2x16xf32>
    %c0_43 = arith.constant 0 : index
    %c0_44 = arith.constant 0 : index
    %57 = vector.load %arg16[%c0_43, %c0_44] : memref<16x128xf32, #tpu.memory_space<vmem>>, vector<16x128xf32>
    %cst_45 = arith.constant dense<0.000000e+00> : vector<2x128xf32>
    %58 = tpu.matmul %56, %57, %cst_45 {dimension_numbers = #tpu.dot_dimension_numbers<[1], [0], [0], [1], [0, 0, 1, 1], [], []>} : vector<2x16xf32>, vector<16x128xf32>, vector<2x128xf32> -> vector<2x128xf32>
    %c0_46 = arith.constant 0 : index
    %c0_47 = arith.constant 0 : index
    %59 = vector.load %arg17[%c0_46, %c0_47] : memref<1x128xf32, #tpu.memory_space<vmem>>, vector<1x128xf32>
    %60 = vector.broadcast %59 : vector<1x128xf32> to vector<2x128xf32>
    %61 = arith.addf %58, %60 : vector<2x128xf32>
    %c0_48 = arith.constant 0 : index
    %c0_49 = arith.constant 0 : index
    %62 = vector.load %arg18[%c0_48, %c0_49] : memref<2x128xf32, #tpu.memory_space<vmem>>, vector<2x128xf32>
    tpu.vector_store %arg18[%c0_48, %c0_49], %61 {strides = array<i32>} : memref<2x128xf32, #tpu.memory_space<vmem>>, vector<2x128xf32>,
    return
  }
}

</mosaic_0001>

<bundles_post_ra>
// kernel: tpu_custom_call.1
= control target key start
LH: loop header
LB: loop body
LE: loop exit
PB: predicated region body
PF: predicated region fallthrough
CT: control target
= control target key end

     0   :  { %s2349_s0 = inlined_call_operand.vmem [shape: f32[16,64], index: 0, kind: input, shape index: {}]   ;;  %s2350_s1 = inlined_call_operand.vmem [shape: f32[64,16], index: 1, kind: input, shape index: {}]   ;;  %s2351_s2 = inlined_call_operand.vmem [shape: f32[64,256], index: 2, kind: input, shape index: {}]   ;;  %s2352_s3 = inlined_call_operand.vmem [shape: f32[1,256], index: 3, kind: input, shape index: {}]   ;;  %s2353_s4 = inlined_call_operand.vmem [shape: f32[64,64], index: 4, kind: input, shape index: {}]   ;;  %s2354_s5 = inlined_call_operand.vmem [shape: f32[64,1], index: 5, kind: input, shape index: {}]   ;;  %s2355_s6 = inlined_call_operand.vmem [shape: bf16[16,128], index: 6, kind: input, shape index: {}]   ;;  %s2356_s7 = inlined_call_operand.vmem [shape: bf16[128,16], index: 7, kind: input, shape index: {}]   ;;  %s2357_s8 = inlined_call_operand.vmem [shape: bf16[64,128], index: 8, kind: input, shape index: {}]   ;;  %s2358_s9 = inlined_call_operand.vmem [shape: bf16[128,128], index: 9, kind: input, shape index: {}]   ;;  %s2359_s10 = inlined_call_operand.vmem [shape: f32[16,128], index: 10, kind: input, shape index: {}]   ;;  %s2360_s11 = inlined_call_operand.vmem [shape: f32[2,16], index: 11, kind: input, shape index: {}]   ;;  %s2361_s12 = inlined_call_operand.vmem [shape: f32[64,32], index: 12, kind: input, shape index: {}]   ;;  %s2362_s13 = inlined_call_operand.vmem [shape: f32[1,32], index: 13, kind: input, shape index: {}]   ;;  %s2363_s14 = inlined_call_operand.vmem [shape: f32[32,16], index: 14, kind: input, shape index: {}]   ;;  %s2364_s15 = inlined_call_operand.hbm [shape: f32[1,16], index: 15, kind: input, shape index: {}]   ;;  %s2365_s16 = inlined_call_operand.vmem [shape: f32[16,128], index: 16, kind: input, shape index: {}]   ;;  %s2366_s17 = inlined_call_operand.vmem [shape: f32[1,128], index: 17, kind: input, shape index: {}]   ;;  %s2367_s18 = inlined_call_operand.hbm [shape: f32[2,128], index: 18, kind: output, shape index: {}]  }
   0x1   :  { %2371 = sst [smem:[#allocation8_spill]] %s2349_s0 }
   0x2   :  { %2372 = sst [smem:[#allocation9_spill]] %s2350_s1 }
   0x3   :  { %2373 = sst [smem:[#allocation10_spill]] %s2351_s2 }
   0x4   :  { %23 = vsyncpa [#allocation3], 0 }
   0x5   :  { %24 = vsyncpa [#allocation4], 0  ;;  %s1922_s27 = smov [#allocation2]   ;;  %s1874_s0 = scalar_lea.hbm %s2364_s15, 16 }
   0x6   :  { %s61_s28 = sshll.u32 %s1922_s27, 4  ;;  %p1875_p0 = scmp.ne.s32.totalorder %s2364_s15, %s1874_s0  ;;  %s62_s28 = int_to_ptr.vmem [resolvable:$true] %s61_s28 }
   0x7   :  { %p1878_p1 = scmp.lt.u32.totalorder %s1874_s0, %s2364_s15 }
   0x9   :  { %p1880_p2 = pnand %p1878_p1, %p1875_p0 }
   0xb   :  { %1883 = shalt.err (!%p1880_p2)
}
   0xc   :  { %s1884_s22 = scalar_lea.vmem %s62_s28, 16  ;;  %s1888_s2 = scalar_lea.vmem %s62_s28, 32 }
   0xd   :  { %p1885_p3 = scmp.ne.s32.totalorder %s62_s28, %s1884_s22  ;;  %p1889_p4 = scmp.lt.s32.totalorder %s62_s28, %s62_s28 }
   0xe   :  { %p1890_p5 = scmp.lt.s32.totalorder %s1888_s2, %s1884_s22 }
  0x10   :  { %p1891_p6 = por %p1890_p5, %p1889_p4 }
  0x12   :  { %p1892_p7 = pnand %p1891_p6, %p1885_p3 }
  0x14   :  { %1895 = shalt.err (!%p1892_p7)
}
  0x15   :  { %64 = dma.hbm_to_vmem [thread:$0]  %s2364_s15, 16, %s62_s28, [#allocation3]  }
  0x16   :  { %1918 = dma.done.wait [#allocation3], 16  }
  0x17   :  { %1919 = vsyncadd [#allocation3], 4294967280  ;;  %v1923_v0 = vmov 0   ;;  %s2374_s27 = sld [smem:[#allocation9_spill]]  ;;  %vm102_vm0 = vcmask 523264   ;;  %v186_v9 = vld [vmem:[%s2353_s4] sm:$0xff]  ;;  %v92_v59 = vlaneseq }
  0x18   :  { %1864 = vset.pattern.permute.xlu0 %v1923_v0  ;;  %1865 = vset.pattern.permute.xlu1 %v1923_v0  ;;  %v202_v11 = vld [vmem:[%s2354_s5] sm:$0xff]  ;;  %v204_v12 = vld [vmem:[%s2354_s5 + $0x10] sm:$0xff]  ;;  %v203_v15 = vld [vmem:[%s2354_s5 + $0x8] sm:$0xff]  ;;  %v1924_v17 = vmov 0.0   ;;  %s2375_s23 = sld [smem:[#allocation10_spill]]  ;;  %s2376_s30 = sld [smem:[#allocation8_spill]] }
  0x19   :  { %1591 = vmatprep.mubr.msk.f32.mxu1 %vm102_vm0, %v186_v9  ;;  %212 = vperm.xlu0 %1864, %v202_v11   ;;  %v205_v16 = vld [vmem:[%s2354_s5 + $0x18] sm:$0xff]  ;;  %v206_v31 = vld [vmem:[%s2354_s5 + $0x20] sm:$0xff]  ;;  %v207_v32 = vld [vmem:[%s2354_s5 + $0x28] sm:$0xff]  ;;  %v93_v62 = vshrl.u32 %v92_v59, 7  ;;  %vm383_vm1 = vcmask 130048   ;;  %vm1926_vm2 = vmmov 0  }
  0x1a   :  { %222 = vperm.xlu1 %1865, %v204_v12   ;;  %173 = vmatprep.mubr.f32.mxu0 %v1924_v17  ;;  %v208_v40 = vld [vmem:[%s2354_s5 + $0x30] sm:$0xff]  ;;  %v209_v41 = vld [vmem:[%s2354_s5 + $0x38] sm:$0xff]  ;;  %v187_v42 = vld [vmem:[%s2353_s4 + $0x8] sm:$0xff]  ;;  %vm1166_vm3 = vcmask 261120   ;;  %s1928_s24 = smov [#allocation5]  }
  0x1b   :  { %v188_v44 = vld [vmem:[%s2353_s4 + $0x10] sm:$0xff]  ;;  %v189_v48 = vld [vmem:[%s2353_s4 + $0x18] sm:$0xff]  ;;  %v190_v50 = vld [vmem:[%s2353_s4 + $0x20] sm:$0xff]  ;;  %v94_v9 = vsub.s32 0, %v93_v62 }
  0x1c   :  { %v1383_v51 = vld [vmem:[%s2355_s6] sm:$0xff]   ;;  %v191_v52 = vld [vmem:[%s2353_s4 + $0x28] sm:$0xff]  ;;  %v192_v54 = vld [vmem:[%s2353_s4 + $0x30] sm:$0xff] }
  0x1d   :  { %v194_v1 = vld [vmem:[%s2374_s27] sm:$0xff]  ;;  %v195_v2 = vld [vmem:[%s2374_s27 + $0x8] sm:$0xff]  ;;  %v196_v3 = vld [vmem:[%s2374_s27 + $0x10] sm:$0xff]  ;;  %217 = vperm.xlu0 %1864, %v203_v15  }
  0x1e   :  { %v1761_v4 = vpack.c.bf16 %v195_v2, %v194_v1  ;;  %v197_v5 = vld [vmem:[%s2374_s27 + $0x18] sm:$0xff]  ;;  %v198_v7 = vld [vmem:[%s2374_s27 + $0x20] sm:$0xff]  ;;  %v199_v8 = vld [vmem:[%s2374_s27 + $0x28] sm:$0xff]  ;;  %227 = vperm.xlu1 %1865, %v205_v16  }
  0x1f   :  { %v1765_v6 = vpack.c.bf16 %v197_v5, %v196_v3  ;;  %v1769_v10 = vpack.c.bf16 %v199_v8, %v198_v7  ;;  %v200_v13 = vld [vmem:[%s2374_s27 + $0x30] sm:$0xff]  ;;  %v201_v14 = vld [vmem:[%s2374_s27 + $0x38] sm:$0xff]  ;;  %v75_v18 = vld [vmem:[%s2375_s23 + $0x8] sm:$0xff]  ;;  %s1330_s27 = sshll.u32 %s1928_s24, 4  ;;  %s1331_s27 = int_to_ptr.vmem [resolvable:$true] %s1330_s27 }
  0x20   :  { %1762 = vmatprep.subr.bf16.mxu1 %v1761_v4  ;;  %v77_v19 = vld [vmem:[%s2375_s23 + $0x18] sm:$0xff]  ;;  %v74_v20 = vld [vmem:[%s2375_s23] sm:$0xff]  ;;  %v1773_v21 = vpack.c.bf16 %v201_v14, %v200_v13  ;;  %v76_v23 = vld [vmem:[%s2375_s23 + $0x10] sm:$0xff]  ;;  %p1901_p9 = scmp.lt.s32.totalorder %s1331_s27, %s1331_s27 }
  0x21   :  { %1764 = vmatpush3.bf16.msra.mxu1 %v1761_v4  ;;  %v1745_v22 = vpack.c.bf16 %v77_v19, %v75_v18  ;;  %v79_v24 = vld [vmem:[%s2375_s23 + $0x28] sm:$0xff]  ;;  %v81_v25 = vld [vmem:[%s2375_s23 + $0x38] sm:$0xff]  ;;  %v1747_v26 = vpack.c.bf16 %v76_v23, %v74_v20  ;;  %v78_v28 = vld [vmem:[%s2375_s23 + $0x20] sm:$0xff]  ;;  %232 = vperm.xlu0 %1864, %v206_v31   ;;  %v98_v4 = vsub.s32 1, %v93_v62 }
  0x22   :  { %1766 = vmatprep.subr.bf16.mxu1 %v1765_v6  ;;  %v1749_v27 = vpack.c.bf16 %v81_v25, %v79_v24  ;;  %v80_v29 = vld [vmem:[%s2375_s23 + $0x30] sm:$0xff]  ;;  %v83_v30 = vld [vmem:[%s2375_s23 + $0x48] sm:$0xff]  ;;  %v85_v33 = vld [vmem:[%s2375_s23 + $0x58] sm:$0xff]  ;;  %237 = vperm.xlu1 %1865, %v207_v32  }
  0x23   :  { %1746 = vmatprep.subr.bf16.mxu0 %v1745_v22  ;;  %v1751_v34 = vpack.c.bf16 %v80_v29, %v78_v28  ;;  %v1753_v35 = vpack.c.bf16 %v85_v33, %v83_v30  ;;  %v82_v36 = vld [vmem:[%s2375_s23 + $0x40] sm:$0xff]  ;;  %v84_v37 = vld [vmem:[%s2375_s23 + $0x50] sm:$0xff]  ;;  %v87_v38 = vld [vmem:[%s2375_s23 + $0x68] sm:$0xff] }
  0x24   :  { %1748 = vmatpush1.bf16.msra.mxu0 %v1747_v26  ;;  %v89_v39 = vld [vmem:[%s2375_s23 + $0x78] sm:$0xff]  ;;  %v1755_v43 = vpack.c.bf16 %v84_v37, %v82_v36  ;;  %v86_v46 = vld [vmem:[%s2375_s23 + $0x60] sm:$0xff]  ;;  %v88_v47 = vld [vmem:[%s2375_s23 + $0x70] sm:$0xff] }
  0x25   :  { %1768 = vmatpush3.bf16.msra.mxu1 %v1765_v6  ;;  %1750 = vmatprep.subr.bf16.mxu0 %v1749_v27  ;;  %v1757_v45 = vpack.c.bf16 %v89_v39, %v87_v38  ;;  %v1759_v49 = vpack.c.bf16 %v88_v47, %v86_v46  ;;  %v72_v53 = vld [vmem:[%s2376_s30] sm:$0xff]  ;;  %v193_v55 = vld [vmem:[%s2353_s4 + $0x38] sm:$0xff]  ;;  %v73_v56 = vld [vmem:[%s2376_s30 + $0x8] sm:$0xff] }
  0x26   :  { %1770 = vmatprep.subr.bf16.mxu1 %v1769_v10  ;;  %242 = vperm.xlu0 %1864, %v208_v40   ;;  %v90_v7 = vld [vmem:[%s2352_s3] sm:$0x3]  ;;  %v1470_v39 = vld [vmem:[%s2356_s7 + $0x10] sm:$0xff]  }
  0x27   :  { %247 = vperm.xlu1 %1865, %v209_v41   ;;  %v99_v14 = vrot.slane %v90_v7, %v98_v4  ;;  %v95_v19 = vrot.slane %v90_v7, %v94_v9  ;;  %v1412_v41 = vunpack.c.l.bf16 %v1470_v39  ;;  %v1467_v4 = vld [vmem:[%s2357_s8 + $0x10] sm:$0xff]  }
  0x28   :  { %1752 = vmatpush1.bf16.msra.mxu0 %v1751_v34  ;;  %v1403_v34 = vld [vmem:[%s2356_s7] sm:$0xff]   ;;  %v1397_v9 = vunpack.c.h.bf16 %v1467_v4 }
  0x29   :  { %1772 = vmatpush3.bf16.msra.mxu1 %v1769_v10  ;;  %1754 = vmatprep.subr.bf16.mxu0 %v1753_v35  ;;  %v1469_v35 = vld [vmem:[%s2356_s7 + $0x8] sm:$0xff]   ;;  %v1404_v36 = vunpack.c.l.bf16 %v1403_v34  ;;  %v1405_v37 = vunpack.c.h.bf16 %v1403_v34 }
  0x2a   :  { %1774 = vmatprep.subr.bf16.mxu1 %v1773_v21  ;;  %v1408_v38 = vunpack.c.l.bf16 %v1469_v35  ;;  %v1409_v40 = vunpack.c.h.bf16 %v1469_v35 }
  0x2c   :  { %1756 = vmatpush1.bf16.msra.mxu0 %v1755_v43  ;;  %v1413_v43 = vunpack.c.h.bf16 %v1470_v39 }
  0x2d   :  { %1776 = vmatpush3.bf16.msra.mxu1 %v1773_v21  ;;  %1758 = vmatprep.subr.bf16.mxu0 %v1757_v45  ;;  %v1472_v45 = vld [vmem:[%s2356_s7 + $0x20] sm:$0xff]  }
  0x2e   :  { %v1420_v47 = vunpack.c.l.bf16 %v1472_v45 }
  0x30   :  { %1592 = vmatmul.mubr.msk.f32.vlgmr.msra.gmra.mrb[0].mxu1 %vm102_vm0, %v187_v42  ;;  %1760 = vmatpush1.bf16.msra.mxu0 %v1759_v49  ;;  %v1471_v42 = vld [vmem:[%s2356_s7 + $0x18] sm:$0xff]   ;;  %v1421_v49 = vunpack.c.h.bf16 %v1472_v45 }
  0x31   :  { %1594 = vmatprep.mubr.msk.f32.mxu1 %vm102_vm0, %v188_v44  ;;  %1778 = vmatprep.subr.bf16.mxu0 %v1383_v51  ;;  %v1416_v44 = vunpack.c.l.bf16 %v1471_v42  ;;  %v1417_v46 = vunpack.c.h.bf16 %v1471_v42  ;;  %v1478_v45 = vld [vmem:[%s2358_s9 + $0x18] sm:$0xff]  }
  0x33   :  { %1339 = vmatmul.mubr.msk.f32.vlgmr.msra.gmra.mrb[0].mxu0 %vm102_vm0, %v72_v53 }
  0x34   :  { %1595 = vmatmul.mubr.msk.f32.gmra.mrb[2].mxu1 %vm102_vm0, %v189_v48  ;;  %179 = vmatprep.mubr.f32.mxu0 %v1924_v17  ;;  %v1473_v48 = vld [vmem:[%s2356_s7 + $0x28] sm:$0xff]  }
  0x35   :  { %1597 = vmatprep.mubr.msk.f32.mxu1 %vm102_vm0, %v190_v50  ;;  %1780 = vmatpush3.bf16.msra.mxu0 %v1383_v51  ;;  %v1424_v50 = vunpack.c.l.bf16 %v1473_v48  ;;  %v1474_v51 = vld [vmem:[%s2356_s7 + $0x30] sm:$0xff]  }
  0x36   :  { %v1428_v53 = vunpack.c.l.bf16 %v1474_v51 }
  0x37   :  { %1340 = vmatmul.mubr.msk.f32.gmra.mrb[2].mxu0 %vm102_vm0, %v73_v56 }
  0x38   :  { %1598 = vmatmul.mubr.msk.f32.gmra.mrb[4].mxu1 %vm102_vm0, %v191_v52  ;;  %v1425_v52 = vunpack.c.h.bf16 %v1473_v48 }
  0x39   :  { %1600 = vmatprep.mubr.msk.f32.mxu1 %vm102_vm0, %v192_v54  ;;  %v1475_v54 = vld [vmem:[%s2356_s7 + $0x38] sm:$0xff]  }
  0x3a   :  { %v1432_v56 = vunpack.c.l.bf16 %v1475_v54 }
  0x3c   :  { %1601 = vmatmul.mubr.msk.f32.gmra.mrb[6].mxu1 %vm102_vm0, %v193_v55  ;;  %v1429_v55 = vunpack.c.h.bf16 %v1474_v51 }
  0x3d   :  { %1623 = vmatprep.mubr.msk.f32.mxu1 %vm383_vm1, %v1404_v36  ;;  %v1477_v36 = vld [vmem:[%s2358_s9 + $0x10] sm:$0xff]  }
  0x3e   :  { %v1445_v42 = vunpack.c.h.bf16 %v1477_v36 }
  0x98   :  { %v213_v57 = vpop.permute.xlu0 %212 }
  0x99   :  { %v223_v58 = vpop.permute.xlu1 %222 }
  0x9c   :  { %v218_v60 = vpop.permute.xlu0 %217 }
  0x9d   :  { %v228_v63 = vpop.permute.xlu1 %227 }
  0xa0   :  { %v233_v5 = vpop.permute.xlu0 %232 }
  0xa1   :  { %v238_v10 = vpop.permute.xlu1 %237 }
  0xa5   :  { %v243_v20 = vpop.permute.xlu0 %242 }
  0xa6   :  { %v248_v28 = vpop.permute.xlu1 %247 }
 0x103   :  { %v1593_v61 = vpop.f32.mrb[0].mxu1 }
 0x104   :  { %v340_v0 = vpop.f32.mrb[1].mxu1  ;;  %v346_v2 = vadd.f32 %v1593_v61, %v218_v60  ;;  %v1466_v61 = vld [vmem:[%s2357_s8 + $0x8] sm:$0xff]  }
 0x105   :  { %v341_v1 = vadd.f32 %v340_v0, %v213_v57  ;;  %v1433_v57 = vunpack.c.h.bf16 %v1475_v54 }
 0x106   :  { %v175_v13 = vpop.f32.mrb[0].mxu0 }
 0x107   :  { %v1596_v3 = vpop.f32.mrb[2].mxu1  ;;  %1607 = vmatprep.mubr.msk.f32.mxu0 %vm383_vm1, %v341_v1  ;;  %v177_v16 = vpop.f32.mrb[1].mxu0  ;;  %v176_v30 = vadd.f32 %v175_v13, %v95_v19  ;;  %v1393_v1 = vunpack.c.h.bf16 %v1466_v61 }
 0x108   :  { %v350_v6 = vpop.f32.mrb[3].mxu1  ;;  %1608 = vmatmul.mubr.msk.f32.vlgmr.msra.gmra.mrb[4].mxu0 %vm383_vm1, %v346_v2  ;;  %v356_v11 = vadd.f32 %v1596_v3, %v228_v63  ;;  %v178_v23 = vadd.f32 %v177_v16, %v99_v14  ;;  %v1392_v3 = vunpack.c.l.bf16 %v1466_v61  ;;  %v1480_v61 = vld [vmem:[%s2358_s9 + $0x28] sm:$0xff]  }
 0x109   :  { %v351_v8 = vadd.f32 %v350_v6, %v223_v58  ;;  %v1387_v58 = vld [vmem:[%s2357_s8] sm:$0xff]  }
 0x10a   :  { %v181_v24 = vpop.f32.mrb[2].mxu0  ;;  %v1389_v59 = vunpack.c.h.bf16 %v1387_v58  ;;  %v1388_v60 = vunpack.c.l.bf16 %v1387_v58 }
 0x10b   :  { %v1599_v12 = vpop.f32.mrb[4].mxu1  ;;  %1610 = vmatprep.mubr.msk.f32.mxu0 %vm383_vm1, %v351_v8  ;;  %v2186_v26 = vadd.f32 %v181_v24, %v95_v19  ;;  %v183_v27 = vpop.f32.mrb[3].mxu0 }
 0x10c   :  { %v360_v15 = vpop.f32.mrb[5].mxu1  ;;  %1611 = vmatmul.mubr.msk.f32.gmra.mrb[6].mxu0 %vm383_vm1, %v356_v11  ;;  %v366_v21 = vadd.f32 %v1599_v12, %v238_v10  ;;  %v184_v31 = vadd.f32 %v183_v27, %v99_v14  ;;  %v1396_v11 = vunpack.c.l.bf16 %v1467_v4  ;;  %v1468_v12 = vld [vmem:[%s2357_s8 + $0x18] sm:$0xff]   ;;  %v1456_v4 = vunpack.c.l.bf16 %v1480_v61 }
 0x10d   :  { %v361_v18 = vadd.f32 %v360_v15, %v233_v5 }
 0x10e   :  { %v1781_v33 = vpack.c.bf16 %v184_v31, %v178_v23 }
 0x10f   :  { %v1602_v22 = vpop.f32.mrb[6].mxu1  ;;  %1613 = vmatprep.mubr.msk.f32.mxu0 %vm383_vm1, %v361_v18  ;;  %v1401_v18 = vunpack.c.h.bf16 %v1468_v12 }
 0x110   :  { %v370_v25 = vpop.f32.mrb[7].mxu1  ;;  %1614 = vmatmul.mubr.msk.f32.gmra.mrb[8].mxu0 %vm383_vm1, %v366_v21  ;;  %v376_v32 = vadd.f32 %v1602_v22, %v248_v28  ;;  %1782 = vmatprep.subr.bf16.mxu1 %v1781_v33 }
 0x111   :  { %v371_v29 = vadd.f32 %v370_v25, %v243_v20  ;;  %1784 = vmatpush3.bf16.msra.mxu1 %v1781_v33  ;;  %v1400_v20 = vunpack.c.l.bf16 %v1468_v12  ;;  %v810_v12 = vld [vmem:[%s2359_s10] sm:$0xff] }
 0x113   :  { %1616 = vmatprep.mubr.msk.f32.mxu0 %vm383_vm1, %v371_v29  ;;  %v1435_v29 = vld [vmem:[%s2358_s9] sm:$0xff]  }
 0x114   :  { %1617 = vmatmul.mubr.msk.f32.gmra.mrb[10].mxu0 %vm383_vm1, %v376_v32  ;;  %1624 = vmatmul.mubr.msk.f32.vlgmr.msra.gmra.mrb[8].mxu1 %vm383_vm1, %v1405_v37  ;;  %v1437_v31 = vunpack.c.h.bf16 %v1435_v29  ;;  %v1436_v33 = vunpack.c.l.bf16 %v1435_v29 }
 0x115   :  { %1663 = vmatprep.mubr.msk.f32.mxu0 %vm102_vm0, %v176_v30  ;;  %1626 = vmatprep.mubr.msk.f32.mxu1 %vm383_vm1, %v1408_v38  ;;  %v1476_v30 = vld [vmem:[%s2358_s9 + $0x8] sm:$0xff]  }
 0x116   :  { %v1441_v34 = vunpack.c.h.bf16 %v1476_v30  ;;  %v1440_v35 = vunpack.c.l.bf16 %v1476_v30 }
 0x118   :  { %1627 = vmatmul.mubr.msk.f32.gmra.mrb[10].mxu1 %vm383_vm1, %v1409_v40 }
 0x119   :  { %1629 = vmatprep.mubr.msk.f32.mxu1 %vm383_vm1, %v1412_v41 }
 0x11c   :  { %1630 = vmatmul.mubr.msk.f32.gmra.mrb[12].mxu1 %vm383_vm1, %v1413_v43 }
 0x11d   :  { %1632 = vmatprep.mubr.msk.f32.mxu1 %vm383_vm1, %v1416_v44  ;;  %v1444_v44 = vunpack.c.l.bf16 %v1477_v36 }
 0x120   :  { %1633 = vmatmul.mubr.msk.f32.gmra.mrb[14].mxu1 %vm383_vm1, %v1417_v46 }
 0x121   :  { %1635 = vmatprep.mubr.msk.f32.mxu1 %vm383_vm1, %v1420_v47 }
 0x124   :  { %1636 = vmatmul.mubr.msk.f32.gmra.mrb[16].mxu1 %vm383_vm1, %v1421_v49 }
 0x125   :  { %1638 = vmatprep.mubr.msk.f32.mxu1 %vm383_vm1, %v1424_v50  ;;  %v1449_v50 = vunpack.c.h.bf16 %v1478_v45 }
 0x128   :  { %1639 = vmatmul.mubr.msk.f32.gmra.mrb[18].mxu1 %vm383_vm1, %v1425_v52  ;;  %v1448_v52 = vunpack.c.l.bf16 %v1478_v45 }
 0x129   :  { %1641 = vmatprep.mubr.msk.f32.mxu1 %vm383_vm1, %v1428_v53  ;;  %v1479_v53 = vld [vmem:[%s2358_s9 + $0x20] sm:$0xff]  }
 0x12a   :  { %v1453_v58 = vunpack.c.h.bf16 %v1479_v53 }
 0x12c   :  { %1642 = vmatmul.mubr.msk.f32.gmra.mrb[20].mxu1 %vm383_vm1, %v1429_v55 }
 0x12d   :  { %1644 = vmatprep.mubr.msk.f32.mxu1 %vm383_vm1, %v1432_v56 }
 0x130   :  { %1645 = vmatmul.mubr.msk.f32.gmra.mrb[22].mxu1 %vm383_vm1, %v1433_v57 }
 0x1db   :  { %v1609_v62 = vpop.f32.mrb[4].mxu0 }
 0x1dc   :  { %v530_v63 = vmul.f32 %v1609_v62, %v1389_v59  ;;  %v474_v0 = vpop.f32.mrb[5].mxu0 }
 0x1dd   :  { %v529_v2 = vmul.f32 %v1388_v60, %v474_v0  ;;  %v1452_v60 = vunpack.c.l.bf16 %v1479_v53  ;;  %v1066_v53 = vld [vmem:[%s2361_s12] sm:$0xff] }
 0x1df   :  { %v1785_v5 = vpack.c.bf16 %v530_v63, %v529_v2  ;;  %v1612_v6 = vpop.f32.mrb[6].mxu0  ;;  %v1457_v2 = vunpack.c.h.bf16 %v1480_v61  ;;  %v1070_v61 = vld [vmem:[%s2361_s12 + $0x20] sm:$0xff] }
 0x1e0   :  { %v532_v7 = vmul.f32 %v1612_v6, %v1393_v1  ;;  %v484_v8 = vpop.f32.mrb[7].mxu0 }
 0x1e1   :  { %v531_v10 = vmul.f32 %v1392_v3, %v484_v8  ;;  %1786 = vmatprep.subr.bf16.mxu0 %v1785_v5 }
 0x1e2   :  { %1788 = vmatpush3.bf16.msra.mxu0 %v1785_v5 }
 0x1e3   :  { %v1789_v13 = vpack.c.bf16 %v532_v7, %v531_v10  ;;  %v1615_v14 = vpop.f32.mrb[8].mxu0 }
 0x1e4   :  { %v534_v15 = vmul.f32 %v1615_v14, %v1397_v9  ;;  %v494_v16 = vpop.f32.mrb[9].mxu0 }
 0x1e5   :  { %v533_v19 = vmul.f32 %v1396_v11, %v494_v16  ;;  %1790 = vmatprep.subr.bf16.mxu0 %v1789_v13  ;;  %v811_v11 = vld [vmem:[%s2359_s10 + $0x8] sm:$0xff] }
 0x1e6   :  { %1792 = vmatpush3.bf16.msra.mxu0 %v1789_v13 }
 0x1e7   :  { %v1793_v21 = vpack.c.bf16 %v534_v15, %v533_v19  ;;  %v1618_v22 = vpop.f32.mrb[10].mxu0  ;;  %v1625_v28 = vpop.f32.mrb[8].mxu1 }
 0x1e8   :  { %v536_v23 = vmul.f32 %v1618_v22, %v1401_v18  ;;  %v504_v24 = vpop.f32.mrb[11].mxu0  ;;  %v683_v32 = vpop.f32.mrb[9].mxu1  ;;  %v795_v37 = vmul.f32 %v1625_v28, %v1437_v31  ;;  %v1481_v18 = vld [vmem:[%s2358_s9 + $0x30] sm:$0xff]  }
 0x1e9   :  { %v535_v25 = vmul.f32 %v1400_v20, %v504_v24  ;;  %1794 = vmatprep.subr.bf16.mxu0 %v1793_v21  ;;  %v1461_v20 = vunpack.c.h.bf16 %v1481_v18 }
 0x1ea   :  { %1796 = vmatpush3.bf16.msra.mxu0 %v1793_v21  ;;  %v1460_v21 = vunpack.c.l.bf16 %v1481_v18 }
 0x1eb   :  { %v1797_v27 = vpack.c.bf16 %v536_v23, %v535_v25  ;;  %v1628_v38 = vpop.f32.mrb[10].mxu1  ;;  %v1482_v25 = vld [vmem:[%s2358_s9 + $0x38] sm:$0xff]   ;;  %s1927_s9 = smov 64  }
 0x1ec   :  { %v797_v40 = vmul.f32 %v1628_v38, %v1441_v34  ;;  %v693_v41 = vpop.f32.mrb[11].mxu1  ;;  %v1465_v29 = vunpack.c.h.bf16 %v1482_v25  ;;  %v1464_v30 = vunpack.c.l.bf16 %v1482_v25 }
 0x1ed   :  { %1798 = vmatprep.subr.bf16.mxu0 %v1797_v27  ;;  %v796_v43 = vmul.f32 %v1440_v35, %v693_v41 }
 0x1ee   :  { %1800 = vmatpush3.bf16.msra.mxu0 %v1797_v27 }
 0x1ef   :  { %v1805_v46 = vpack.c.bf16 %v797_v40, %v796_v43  ;;  %v1631_v47 = vpop.f32.mrb[12].mxu1 }
 0x1f0   :  { %v799_v48 = vmul.f32 %v1631_v47, %v1445_v42  ;;  %v703_v49 = vpop.f32.mrb[13].mxu1 }
 0x1f1   :  { %1664 = vmatmul.mubr.msk.f32.vlgmr.msra.gmra.mrb[12].mxu0 %vm102_vm0, %v2186_v26  ;;  %v794_v26 = vmul.f32 %v1436_v33, %v683_v32  ;;  %v798_v51 = vmul.f32 %v1444_v44, %v703_v49 }
 0x1f2   :  { %1705 = vmatprep.mubr.msk.f32.mxu0 %vm1926_vm2, %v1924_v17 }
 0x1f3   :  { %v1801_v39 = vpack.c.bf16 %v795_v37, %v794_v26  ;;  %v1809_v54 = vpack.c.bf16 %v799_v48, %v798_v51  ;;  %v1634_v55 = vpop.f32.mrb[14].mxu1 }
 0x1f4   :  { %v801_v56 = vmul.f32 %v1634_v55, %v1449_v50  ;;  %v713_v57 = vpop.f32.mrb[15].mxu1 }
 0x1f5   :  { %1802 = vmatprep.subr.bf16.mxu1 %v1801_v39  ;;  %v800_v59 = vmul.f32 %v1448_v52, %v713_v57 }
 0x1f6   :  { %1804 = vmatpush3.bf16.msra.mxu1 %v1801_v39 }
 0x1f7   :  { %1806 = vmatprep.subr.bf16.mxu1 %v1805_v46  ;;  %v1813_v62 = vpack.c.bf16 %v801_v56, %v800_v59  ;;  %v1637_v63 = vpop.f32.mrb[16].mxu1  ;;  %v992_v56 = vld [vmem:[%s2360_s11] sm:$0x3]  ;;  %v1069_v59 = vld [vmem:[%s2361_s12 + $0x18] sm:$0xff] }
 0x1f8   :  { %v803_v0 = vmul.f32 %v1637_v63, %v1453_v58  ;;  %v723_v1 = vpop.f32.mrb[17].mxu1  ;;  %v1068_v58 = vld [vmem:[%s2361_s12 + $0x10] sm:$0xff] }
 0x1f9   :  { %v802_v3 = vmul.f32 %v1452_v60, %v723_v1  ;;  %v1840_v60 = vpack.c.bf16 %v1069_v59, %v1068_v58  ;;  %v1073_v1 = vld [vmem:[%s2361_s12 + $0x38] sm:$0xff] }
 0x1fa   :  { %1808 = vmatpush3.bf16.msra.mxu1 %v1805_v46  ;;  %v1925_v46 = vmov 0.0|0.0  }
 0x1fb   :  { %1810 = vmatprep.subr.bf16.mxu1 %v1809_v54  ;;  %v1817_v5 = vpack.c.bf16 %v803_v0, %v802_v3  ;;  %v1640_v6 = vpop.f32.mrb[18].mxu1  ;;  %1833 = vmatprep.subr.bf16.mxu0 %v1925_v46  ;;  %v1072_v0 = vld [vmem:[%s2361_s12 + $0x30] sm:$0xff]  ;;  %v1155_v3 = vld [vmem:[%s2363_s14] sm:$0xff] }
 0x1fc   :  { %v805_v7 = vmul.f32 %v1640_v6, %v1457_v2  ;;  %v733_v8 = vpop.f32.mrb[19].mxu1  ;;  %v1846_v2 = vpack.c.bf16 %v1073_v1, %v1072_v0 }
 0x1fd   :  { %v804_v9 = vmul.f32 %v1456_v4, %v733_v8  ;;  %v1156_v4 = vld [vmem:[%s2363_s14 + $0x8] sm:$0xff]  ;;  %v1157_v8 = vld [vmem:[%s2363_s14 + $0x10] sm:$0xff] }
 0x1fe   :  { %1812 = vmatpush3.bf16.msra.mxu1 %v1809_v54  ;;  %v1067_v54 = vld [vmem:[%s2361_s12 + $0x8] sm:$0xff] }
 0x1ff   :  { %1814 = vmatprep.subr.bf16.mxu1 %v1813_v62  ;;  %v1821_v10 = vpack.c.bf16 %v805_v7, %v804_v9  ;;  %v1643_v19 = vpop.f32.mrb[20].mxu1  ;;  %v1837_v57 = vpack.c.bf16 %v1067_v54, %v1066_v53  ;;  %v1158_v9 = vld [vmem:[%s2363_s14 + $0x18] sm:$0xff] }
 0x200   :  { %v743_v22 = vpop.f32.mrb[21].mxu1  ;;  %v807_v23 = vmul.f32 %v1643_v19, %v1461_v20  ;;  %v1378_v19 = vld [vmem:[#allocation2] ss:$0 sm:$0xff] }
 0x201   :  { %v806_v24 = vmul.f32 %v1460_v21, %v743_v22 }
 0x202   :  { %1816 = vmatpush3.bf16.msra.mxu1 %v1813_v62  ;;  %v1071_v62 = vld [vmem:[%s2361_s12 + $0x28] sm:$0xff] }
 0x203   :  { %1818 = vmatprep.subr.bf16.mxu1 %v1817_v5  ;;  %v1825_v27 = vpack.c.bf16 %v807_v23, %v806_v24  ;;  %v1646_v28 = vpop.f32.mrb[22].mxu1  ;;  %v1843_v63 = vpack.c.bf16 %v1071_v62, %v1070_v61  ;;  %v1380_v24 = vld [vmem:[%s2366_s17] ss:$0 sm:$0xff] }
 0x204   :  { %v753_v31 = vpop.f32.mrb[23].mxu1  ;;  %v809_v32 = vmul.f32 %v1646_v28, %v1465_v29 }
 0x205   :  { %v808_v33 = vmul.f32 %v1464_v30, %v753_v31 }
 0x206   :  { %1820 = vmatpush3.bf16.msra.mxu1 %v1817_v5  ;;  %v1849_v5 = vpack.c.bf16 %v1156_v4, %v1155_v3 }
 0x207   :  { %1822 = vmatprep.subr.bf16.mxu1 %v1821_v10  ;;  %v1829_v34 = vpack.c.bf16 %v809_v32, %v808_v33 }
 0x20a   :  { %1824 = vmatpush3.bf16.msra.mxu1 %v1821_v10  ;;  %v1852_v10 = vpack.c.bf16 %v1158_v9, %v1157_v8 }
 0x20b   :  { %1826 = vmatprep.subr.bf16.mxu1 %v1825_v27 }
 0x20e   :  { %1828 = vmatpush3.bf16.msra.mxu1 %v1825_v27 }
 0x20f   :  { %1830 = vmatprep.subr.bf16.mxu1 %v1829_v34 }
 0x212   :  { %1832 = vmatpush3.bf16.msra.mxu1 %v1829_v34 }
 0x213   :  { %1854 = vmatprep.subr.bf16.mxu1 %v1925_v46 }
 0x2c4   :  { %v1665_v13 = vpop.f32.mrb[12].mxu0 }
 0x2c5   :  { %v890_v14 = vadd.f32 %v1665_v13, %v811_v11  ;;  %v884_v15 = vpop.f32.mrb[13].mxu0  ;;  %v1376_v11 = vld [vmem:[%s2362_s13] ss:$0 sm:$0xff] }
 0x2c6   :  { %v885_v16 = vadd.f32 %v884_v15, %v810_v12  ;;  %v1241_v15 = vld [vmem:[%s2365_s16] sm:$0xff] }
 0x2c7   :  { %895 = vmax.xlane.f32.xlu1 %v890_v14 }
 0x2c8   :  { %893 = vmax.xlane.f32.xlu0 %v885_v16 }
 0x354   :  { %v896_v35 = vpop.xlane.xlu1 %895 }
 0x355   :  { %v898_v36 = vsub.f32 %v890_v14, %v896_v35  ;;  %v894_v37 = vpop.xlane.xlu0 %893 }
 0x356   :  { %v897_v26 = vsub.f32 %v885_v16, %v894_v37  ;;  %v1242_v16 = vld [vmem:[%s2365_s16 + $0x8] sm:$0xff]  ;;  %s1896_s16 = scalar_lea.vmem %s1331_s27, 32 }
 0x357   :  { %v901_v38 = vmul.f32 1.442695, %v898_v36  ;;  %v1855_v18 = vpack.c.bf16 %v1242_v16, %v1241_v15  ;;  %p1897_p8 = scmp.ne.s32.totalorder %s1331_s27, %s1896_s16  ;;  %p1902_p10 = scmp.lt.s32.totalorder %s1896_s16, %s1896_s16 }
 0x358   :  { %v899_v39 = vmul.f32 1.442695, %v897_v26 }
 0x359   :  { %p1903_p11 = por %p1902_p10, %p1901_p9 }
 0x35a   :  { %1866 = vpow2.f32 %v899_v39 }
 0x35b   :  { %1868 = vpow2.f32 %v901_v38  ;;  %p1904_p12 = pnand %p1903_p11, %p1897_p8 }
 0x364   :  { %v1867_v40 = vpop.eup %1866 }
 0x365   :  { %v1869_v41 = vpop.eup %1868  ;;  %1698 = vmatprep.mubr.f32.mxu1 %v1867_v40 }
 0x366   :  { %1699 = vmatmul.mubr.f32.vlgmr.msra.gmra.mrb[24].mxu1 %v1869_v41 }
 0x367   :  { %1742 = vmatprep.mubr.msk.f32.mxu1 %vm1926_vm2, %v1924_v17  ;;  %1856 = vmatpush3.bf16.msra.mxu1 %v1855_v18 }
 0x439   :  { %v1700_v42 = vpop.f32.mrb[24].mxu1 }
 0x43a   :  { %v979_v43 = vmax.f32 %v1700_v42, 1e-20  ;;  %v969_v44 = vpop.f32.mrb[25].mxu1 }
 0x43b   :  { %v978_v45 = vmax.f32 %v969_v44, 1e-20 }
 0x43c   :  { %1870 = vrcp.f32 %v979_v43 }
 0x43d   :  { %1872 = vrcp.f32 %v978_v45 }
 0x446   :  { %v1871_v47 = vpop.eup %1870 }
 0x447   :  { %v1873_v48 = vpop.eup %1872  ;;  %986 = vrot.lane.b32.xlu1 %v1871_v47, %s1927_s9 }
 0x448   :  { %984 = vrot.lane.b32.xlu0 %v1873_v48, %s1927_s9 }
 0x4b9   :  { %v987_v49 = vpop.permute.xlu1 %986 }
 0x4ba   :  { %v991_v50 = vmul.f32 %v1700_v42, %v987_v49  ;;  %v985_v51 = vpop.permute.xlu0 %984 }
 0x4bb   :  { %v990_v52 = vmul.f32 %v985_v51, %v969_v44 }
 0x4bd   :  { %v1834_v55 = vpack.c.bf16 %v991_v50, %v990_v52 }
 0x4bf   :  { %1835 = vmatpush3.bf16.msra.mxu0 %v1834_v55 }
 0x4c0   :  { %1836 = vmatprep.subr.bf16.mxu0 %v1925_v46 }
 0x4c2   :  { %1706 = vmatmul.mubr.msk.f32.vlgmr.msra.gmra.mrb[14].mxu0 %vm383_vm1, %v992_v56 }
 0x4c3   :  { %1838 = vmatpush3.bf16.msra.mxu0 %v1837_v57  ;;  %1724 = vmatprep.mubr.msk.f32.mxu0 %vm1926_vm2, %v1924_v17 }
 0x4c4   :  { %1839 = vmatprep.subr.bf16.mxu0 %v1925_v46 }
 0x4c7   :  { %1841 = vmatpush3.bf16.msra.mxu0 %v1840_v60 }
 0x4c8   :  { %1842 = vmatprep.subr.bf16.mxu0 %v1925_v46 }
 0x4cb   :  { %1844 = vmatpush3.bf16.msra.mxu0 %v1843_v63 }
 0x4cc   :  { %1845 = vmatprep.subr.bf16.mxu0 %v1925_v46 }
 0x4cf   :  { %1847 = vmatpush3.bf16.msra.mxu0 %v1846_v2 }
 0x4d0   :  { %1848 = vmatprep.subr.bf16.mxu0 %v1925_v46 }
 0x595   :  { %v1062_v6 = vpop.f32.mrb[14].mxu0 }
 0x596   :  { %v1707_v7 = vpop.f32.mrb[15].mxu0  ;;  %1725 = vmatmul.mubr.msk.f32.vlgmr.msra.gmra.mrb[16].mxu0 %vm102_vm0, %v1062_v6 }
 0x597   :  { %1850 = vmatpush3.bf16.msra.mxu0 %v1849_v5  ;;  %1735 = vmatprep.mubr.msk.f32.mxu0 %vm1926_vm2, %v1924_v17 }
 0x598   :  { %1851 = vmatprep.subr.bf16.mxu0 %v1925_v46 }
 0x59b   :  { %1853 = vmatpush3.bf16.msra.mxu0 %v1852_v10 }
 0x669   :  { %v1150_v12 = vpop.f32.mrb[16].mxu0 }
 0x66a   :  { %v1151_v13 = vadd.f32 %v1376_v11, %v1150_v12  ;;  %v1726_v14 = vpop.f32.mrb[17].mxu0 }
 0x66c   :  { %v1154_v17 = vmax.f32 %v1151_v13, 0.0 }
 0x66e   :  { %1736 = vmatmul.mubr.msk.f32.vlgmr.msra.gmra.mrb[18].mxu0 %vm1166_vm3, %v1154_v17 }
 0x741   :  { %v1236_v20 = vpop.f32.mrb[18].mxu0 }
 0x742   :  { %v1237_v21 = vadd.f32 %v1378_v19, %v1236_v20  ;;  %v1737_v22 = vpop.f32.mrb[19].mxu0 }
 0x744   :  { %v1240_v23 = vmax.f32 %v1237_v21, 0.0 }
 0x746   :  { %1743 = vmatmul.mubr.msk.f32.vlgmr.msra.gmra.mrb[26].mxu1 %vm383_vm1, %v1240_v23 }
 0x819   :  { %v1319_v25 = vpop.f32.mrb[26].mxu1 }
 0x81a   :  { %v1320_v27 = vadd.f32 %v1380_v24, %v1319_v25  ;;  %v1744_v28 = vpop.f32.mrb[27].mxu1 }
 0x81c   :  { %1323 = vst [vmem:[#allocation5] sm:$0x3] %v1320_v27 }
 0x81d   :  { %1907 = shalt.err (!%p1904_p12)
}
 0x81e   :  { %s1908_s26 = scalar_lea.hbm %s2367_s18, 32 }
 0x81f   :  { %p1909_p13 = scmp.ne.s32.totalorder %s2367_s18, %s1908_s26  ;;  %p1912_p0 = scmp.lt.u32.totalorder %s1908_s26, %s2367_s18 }
 0x821   :  { %p1914_p1 = pnand %p1912_p0, %p1909_p13 }
 0x823   :  { %1917 = shalt.err (!%p1914_p1)
}
 0x824   :  { %1333 = dma.vmem_to_hbm [thread:$0]  %s1331_s27, 32, %s2367_s18, [#allocation4]  }
 0x825   :  { %1920 = dma.done.wait [#allocation4], 32  }
 0x826   :  { %1921 = vsyncadd [#allocation4], 4294967264 }
 0x827   :  { %1337 = vsyncpa [#allocation3], 1 }
 0x828   :  { %1338 = vsyncpa [#allocation4], 1 }

</bundles_post_ra>
